<compile_context>
chip_gen: v7x
topology: tpu7x:2x2x1
jax: 0.10.0
libtpu: 0.0.40
codegen_flags: <defaults>
</compile_context>

<pallas_src>
import functools

import jax
import jax.numpy as jnp
import numpy as np
from jax.experimental import pallas as pl
from jax.experimental.pallas import tpu as pltpu


# ----------------------------------------------------------------------------
# Fused kernel: SEV loss + BaselinePositiveLoss + BCELoss in one pass.
# ----------------------------------------------------------------------------
def _fused_kernel(x_ref, mask_ref, w_ref, off_ref, dmean_ref, o_ref, t_ref,
                  loss_ref, sev_ref, pos_ref,
                  num_scr, den_scr, *, k_sel, n_bce):
    i = pl.program_id(0)

    @pl.when(i == 0)
    def _():
        num_scr[...] = jnp.zeros_like(num_scr)
        den_scr[...] = jnp.zeros_like(den_scr)

    # One MXU pass per tile: columns 0..K-1 are the SEV-masked weight vectors,
    # column K is the plain weight vector (=> y_pred = model(x)).  The bias is
    # folded into off_ref, so no per-tile broadcast of b.
    x = x_ref[...]                                                 # (TN, D)
    logits = jnp.dot(x, w_ref[...],
                     preferred_element_type=jnp.float32) + off_ref[...]  # (TN, K+1)
    probs = jax.nn.sigmoid(logits)

    min_sel = jnp.min(probs[:, :k_sel], axis=1, keepdims=True)     # (TN, 1)
    y_pred = probs[:, k_sel:k_sel + 1]                             # (TN, 1)

    # mask_ref zeroes out padded rows so they never count in gt / the sums.
    gt = jnp.where(y_pred > 0.5, 1.0, 0.0) * mask_ref[...]         # (TN, 1)
    clamped = jnp.maximum(min_sel - 0.5, -0.05)                    # (TN, 1)

    num_scr[...] += jnp.sum(clamped * gt, keepdims=True)           # (1, 1)
    den_scr[...] += jnp.sum(gt, keepdims=True)                     # (1, 1)

    @pl.when(i == pl.num_programs(0) - 1)
    def _():
        # SEV core: sum(clamp(min - 0.5, -0.05) * gt) / (sum(gt) + 1e-10)
        sev_ref[...] = num_scr[...] / (den_scr[...] + 1e-10)

        # BaselinePositiveLoss core: clamp(model(data_mean) - 0.5, min=-0.05).
        # Reuses column K (plain w) of the augmented weight matrix.
        lm = jnp.dot(dmean_ref[...], w_ref[...],
                     preferred_element_type=jnp.float32) + off_ref[...]   # (1, K+1)
        p_base = jax.nn.sigmoid(lm[:, k_sel:k_sel + 1])                    # (1, 1)
        pos_ref[...] = jnp.maximum(p_base - 0.5, -0.05)

        # BCELoss (mean), log clamped at -100 like PyTorch.  Padded slots hold
        # (o=1, t=1) so their per-element term is exactly zero.
        o = o_ref[...]
        t = t_ref[...]
        per = -(t * jnp.maximum(jnp.log(o), -100.0)
                + (1.0 - t) * jnp.maximum(jnp.log(1.0 - o), -100.0))
        loss_ref[...] = jnp.sum(per, keepdims=True) * (1.0 / float(n_bce))


# ----------------------------------------------------------------------------
# Forward (AllOptRestricted.forward)
# ----------------------------------------------------------------------------
def all_opt_restricted_forward(output, target, x, params, choices):
    w, b, data_map, data_mean_map, data_mean, sev_penalty, positive_penalty = params

    x = x.astype(jnp.float32)
    w = jnp.asarray(w, jnp.float32)
    b = jnp.asarray(b, jnp.float32)
    n, d = x.shape
    choices = jnp.asarray(choices, dtype=jnp.int32)
    k_sel = int(choices.shape[0])

    # --- tiny O(K*D) glue (mask gather + masked-weight/offset build) --------
    dm_sel = data_map[choices].astype(jnp.float32)                 # (K, D)
    dmm_sel = data_mean_map[choices].astype(jnp.float32)           # (K, D)
    w_masked = (w[None, :] * (dm_sel == 0.0)).T                    # (D, K)
    w_aug = jnp.concatenate([w_masked, w[:, None]], axis=1)        # (D, K+1)
    off = jnp.sum(dmm_sel * w[None, :] * (dm_sel != 0.0), axis=1) + b   # (K,)
    off_aug = jnp.concatenate([off, b[None]]).reshape(1, k_sel + 1)     # (1, K+1)

    # --- N-tiling (kept modest so double-buffered x fits v7x's 64 MiB VMEM) -
    tile_n = min(512, ((n + 7) // 8) * 8)
    n_pad = ((n + tile_n - 1) // tile_n) * tile_n
    x_pad = jnp.pad(x, ((0, n_pad - n), (0, 0)))
    row_mask = (jnp.arange(n_pad) < n).astype(jnp.float32).reshape(n_pad, 1)

    # --- lane-dense BCE operands ---------------------------------------------
    r = (n + 127) // 128
    o_pad = jnp.ones((r * 128,), jnp.float32).at[:n].set(
        output.astype(jnp.float32)).reshape(r, 128)
    t_pad = jnp.ones((r * 128,), jnp.float32).at[:n].set(
        target.astype(jnp.float32)).reshape(r, 128)

    dmean_row = data_mean.reshape(1, d).astype(jnp.float32)

    kernel = functools.partial(_fused_kernel, k_sel=k_sel, n_bce=n)

    loss11, sev11, pos11 = pl.pallas_call(
        kernel,
        out_shape=(jax.ShapeDtypeStruct((1, 1), jnp.float32),   # bce loss
                   jax.ShapeDtypeStruct((1, 1), jnp.float32),   # sev (raw)
                   jax.ShapeDtypeStruct((1, 1), jnp.float32)),  # positive (raw)
        grid_spec=pltpu.PrefetchScalarGridSpec(
            num_scalar_prefetch=0,
            grid=(n_pad // tile_n,),
            in_specs=[
                pl.BlockSpec((tile_n, d), lambda i: (i, 0)),          # x tile
                pl.BlockSpec((tile_n, 1), lambda i: (i, 0)),          # row validity
                pl.BlockSpec((d, k_sel + 1), lambda i: (0, 0)),       # W_aug (resident)
                pl.BlockSpec((1, k_sel + 1), lambda i: (0, 0)),       # offsets (resident)
                pl.BlockSpec((1, d), lambda i: (0, 0)),               # data_mean (resident)
                pl.BlockSpec((r, 128), lambda i: (0, 0)),             # BCE output (resident)
                pl.BlockSpec((r, 128), lambda i: (0, 0)),             # BCE target (resident)
            ],
            out_specs=(pl.BlockSpec((1, 1), lambda i: (0, 0)),
                       pl.BlockSpec((1, 1), lambda i: (0, 0)),
                       pl.BlockSpec((1, 1), lambda i: (0, 0))),
            scratch_shapes=[pltpu.VMEM((1, 1), jnp.float32),          # sum(clamped*gt)
                            pltpu.VMEM((1, 1), jnp.float32)],         # sum(gt)
        ),
        compiler_params=pltpu.CompilerParams(
            # N axis accumulates into the scalar scratch -> reduction semantics.
            dimension_semantics=("arbitrary",)),
    )(x_pad, row_mask, w_aug, off_aug, dmean_row, o_pad, t_pad)

    loss = loss11[0, 0]
    sev_loss = sev_penalty * sev11[0, 0]                # scalar
    positive_loss = positive_penalty * pos11[0]         # shape (1,) like torch's [1]
    total = loss + sev_loss + positive_loss             # shape (1,) via broadcast
    return loss, total, sev_loss


# ----------------------------------------------------------------------------
# Pure-JAX reference (mirrors the PyTorch code) for correctness checking.
# ----------------------------------------------------------------------------
def ref_forward(output, target, x, params, choices):
    w, b, data_map, data_mean_map, data_mean, sev_penalty, positive_penalty = params
    o, t = output, target
    bce = jnp.mean(-(t * jnp.maximum(jnp.log(o), -100.0)
                     + (1.0 - t) * jnp.maximum(jnp.log(1.0 - o), -100.0)))
    model = lambda z: jax.nn.sigmoid(z @ w + b)
    ds = jnp.where(data_map[:, None, :] == 0, x[None, :, :], data_mean_map[:, None, :])
    out_all = model(ds)                       # (M, N)
    out_sel = out_all[jnp.asarray(choices)]   # (K, N)
    y_pred = model(x)                         # (N,)
    gt = (y_pred > 0.5).astype(jnp.float32)
    sev = sev_penalty * (jnp.sum(jnp.maximum(jnp.min(out_sel, axis=0) - 0.5, -0.05) * gt)
                         / (jnp.sum(gt) + 1e-10))
    pos = positive_penalty * jnp.maximum(model(data_mean.reshape(1, -1)) - 0.5, -0.05)  # (1,)
    total = bce + sev + pos
    return bce, total, sev


if __name__ == "__main__":
    N, D, M = 8, 16, 6
    choices = [0, 2, 3, 5]

    key = jax.random.PRNGKey(0)
    k1, k2, k3, k4, k5, k6 = jax.random.split(key, 6)

    x = jax.random.normal(k1, (N, D), dtype=jnp.float32)
    data_map = jax.random.bernoulli(k2, 0.5, (M, D)).astype(jnp.float32)
    data_mean = 0.5 * jax.random.normal(k3, (D,), dtype=jnp.float32)
    data_mean_map = jnp.tile(data_mean[None, :], (M, 1))
    w = 0.5 * jax.random.normal(k4, (D,), dtype=jnp.float32)
    b = jnp.float32(0.1)
    output = jnp.clip(jax.random.uniform(k5, (N,), dtype=jnp.float32), 0.01, 0.99)
    target = jax.random.bernoulli(k6, 0.5, (N,)).astype(jnp.float32)
    sev_penalty = 0.1
    positive_penalty = 0.05

    params = (w, b, data_map, data_mean_map, data_mean, sev_penalty, positive_penalty)

    loss, total, sev = all_opt_restricted_forward(output, target, x, params, choices)
    jax.block_until_ready((loss, total, sev))

    r_loss, r_total, r_sev = ref_forward(output, target, x, params, choices)
    np.testing.assert_allclose(np.asarray(loss), np.asarray(r_loss), rtol=1e-4, atol=1e-4)
    np.testing.assert_allclose(np.asarray(total), np.asarray(r_total), rtol=1e-4, atol=1e-4)
    np.testing.assert_allclose(np.asarray(sev), np.asarray(r_sev), rtol=1e-4, atol=1e-4)

    print("KERNEL_OK")
</pallas_src>

<mosaic_0001>
module attributes {stable_mosaic.version = 11 : i64} {
  func.func @_fused_kernel(%arg0: i32, %arg1: memref<8x16xf32, #tpu.memory_space<vmem>>, %arg2: memref<8x1xf32, #tpu.memory_space<vmem>>, %arg3: memref<16x5xf32, #tpu.memory_space<vmem>>, %arg4: memref<1x5xf32, #tpu.memory_space<vmem>>, %arg5: memref<1x16xf32, #tpu.memory_space<vmem>>, %arg6: memref<1x128xf32, #tpu.memory_space<vmem>>, %arg7: memref<1x128xf32, #tpu.memory_space<vmem>>, %arg8: memref<1x1xf32, #tpu.memory_space<vmem>>, %arg9: memref<1x1xf32, #tpu.memory_space<vmem>>, %arg10: memref<1x1xf32, #tpu.memory_space<vmem>>, %arg11: memref<1x1xf32, #tpu.memory_space<vmem>>, %arg12: memref<1x1xf32, #tpu.memory_space<vmem>>) attributes {dimension_semantics = [#tpu.dimension_semantics<arbitrary>], iteration_bounds = array<i64: 1>, scalar_prefetch = 0 : i64, scratch_operands = 2 : i64, tpu.core_type = #tpu.core_type<tc>, window_params = [{transform_indices = @transform_0, window_bounds = array<i64: 8, 16>}, {transform_indices = @transform_1, window_bounds = array<i64: 8, 1>}, {pipeline_mode = #tpu.pipeline_mode<synchronous>, transform_indices = @transform_2, window_bounds = array<i64: 16, 5>}, {pipeline_mode = #tpu.pipeline_mode<synchronous>, transform_indices = @transform_3, window_bounds = array<i64: 1, 5>}, {pipeline_mode = #tpu.pipeline_mode<synchronous>, transform_indices = @transform_4, window_bounds = array<i64: 1, 16>}, {pipeline_mode = #tpu.pipeline_mode<synchronous>, transform_indices = @transform_5, window_bounds = array<i64: 1, 128>}, {pipeline_mode = #tpu.pipeline_mode<synchronous>, transform_indices = @transform_6, window_bounds = array<i64: 1, 128>}, {pipeline_mode = #tpu.pipeline_mode<synchronous>, transform_indices = @transform_7, window_bounds = array<i64: 1, 1>}, {pipeline_mode = #tpu.pipeline_mode<synchronous>, transform_indices = @transform_8, window_bounds = array<i64: 1, 1>}, {pipeline_mode = #tpu.pipeline_mode<synchronous>, transform_indices = @transform_9, window_bounds = array<i64: 1, 1>}]} {
    %c0_i32 = arith.constant 0 : i32
    %0 = arith.cmpi eq, %arg0, %c0_i32 : i32
    %1 = arith.extui %0 : i1 to i32
    %c0_i32_0 = arith.constant 0 : i32
    %2 = arith.cmpi ne, %1, %c0_i32_0 : i32
    scf.if %2 {
      %cst_27 = arith.constant 0.000000e+00 : f32
      %49 = vector.broadcast %cst_27 : f32 to vector<1x1xf32>
      %c0_28 = arith.constant 0 : index
      %c0_29 = arith.constant 0 : index
      %50 = vector.load %arg11[%c0_28, %c0_29] : memref<1x1xf32, #tpu.memory_space<vmem>>, vector<1x1xf32>
      tpu.vector_store %arg11[%c0_28, %c0_29], %49 {strides = array<i32>} : memref<1x1xf32, #tpu.memory_space<vmem>>, vector<1x1xf32>,
      %cst_30 = arith.constant 0.000000e+00 : f32
      %51 = vector.broadcast %cst_30 : f32 to vector<1x1xf32>
      %c0_31 = arith.constant 0 : index
      %c0_32 = arith.constant 0 : index
      %52 = vector.load %arg12[%c0_31, %c0_32] : memref<1x1xf32, #tpu.memory_space<vmem>>, vector<1x1xf32>
      tpu.vector_store %arg12[%c0_31, %c0_32], %51 {strides = array<i32>} : memref<1x1xf32, #tpu.memory_space<vmem>>, vector<1x1xf32>,
    } else {
    }
    %c0 = arith.constant 0 : index
    %c0_1 = arith.constant 0 : index
    %3 = vector.load %arg1[%c0, %c0_1] : memref<8x16xf32, #tpu.memory_space<vmem>>, vector<8x16xf32>
    %c0_2 = arith.constant 0 : index
    %c0_3 = arith.constant 0 : index
    %4 = vector.load %arg3[%c0_2, %c0_3] : memref<16x5xf32, #tpu.memory_space<vmem>>, vector<16x5xf32>
    %cst = arith.constant dense<0.000000e+00> : vector<8x5xf32>
    %5 = tpu.matmul %3, %4, %cst {dimension_numbers = #tpu.dot_dimension_numbers<[1], [0], [0], [1], [0, 0, 1, 1], [], []>} : vector<8x16xf32>, vector<16x5xf32>, vector<8x5xf32> -> vector<8x5xf32>
    %c0_4 = arith.constant 0 : index
    %c0_5 = arith.constant 0 : index
    %6 = vector.load %arg4[%c0_4, %c0_5] : memref<1x5xf32, #tpu.memory_space<vmem>>, vector<1x5xf32>
    %7 = vector.broadcast %6 : vector<1x5xf32> to vector<8x5xf32>
    %8 = arith.addf %5, %7 : vector<8x5xf32>
    %9 = arith.negf %8 : vector<8x5xf32>
    %10 = math.exp %9 : vector<8x5xf32>
    %cst_6 = arith.constant 1.000000e+00 : f32
    %11 = vector.broadcast %cst_6 : f32 to vector<8x5xf32>
    %12 = arith.addf %11, %10 : vector<8x5xf32>
    %13 = arith.divf %11, %12 : vector<8x5xf32>
    %14 = vector.extract_strided_slice %13 {offsets = [0, 0], sizes = [8, 4], strides = [1, 1]} : vector<8x5xf32> to vector<8x4xf32>
    %cst_7 = arith.constant dense<0x7F800000> : vector<8xf32>
    %15 = vector.multi_reduction <minimumf>, %14, %cst_7 [1] : vector<8x4xf32> to vector<8xf32>
    %16 = vector.shape_cast %15 : vector<8xf32> to vector<8x1xf32>
    %17 = vector.extract_strided_slice %13 {offsets = [0, 4], sizes = [8, 1], strides = [1, 1]} : vector<8x5xf32> to vector<8x1xf32>
    %cst_8 = arith.constant 5.000000e-01 : f32
    %18 = vector.broadcast %cst_8 : f32 to vector<8x1xf32>
    %19 = arith.cmpf ogt, %17, %18 : vector<8x1xf32>
    %cst_9 = arith.constant 1.000000e+00 : f32
    %cst_10 = arith.constant 0.000000e+00 : f32
    %20 = vector.broadcast %cst_9 : f32 to vector<8x1xf32>
    %21 = vector.broadcast %cst_10 : f32 to vector<8x1xf32>
    %22 = arith.select %19, %20, %21 : vector<8x1xi1>, vector<8x1xf32>
    %c0_11 = arith.constant 0 : index
    %c0_12 = arith.constant 0 : index
    %23 = vector.load %arg2[%c0_11, %c0_12] : memref<8x1xf32, #tpu.memory_space<vmem>>, vector<8x1xf32>
    %24 = arith.mulf %22, %23 : vector<8x1xf32>
    %cst_13 = arith.constant 5.000000e-01 : f32
    %25 = vector.broadcast %cst_13 : f32 to vector<8x1xf32>
    %26 = arith.subf %16, %25 : vector<8x1xf32>
    %cst_14 = arith.constant -5.000000e-02 : f32
    %27 = vector.broadcast %cst_14 : f32 to vector<8x1xf32>
    %28 = arith.maximumf %26, %27 : vector<8x1xf32>
    %c0_15 = arith.constant 0 : index
    %c0_16 = arith.constant 0 : index
    %29 = vector.load %arg11[%c0_15, %c0_16] : memref<1x1xf32, #tpu.memory_space<vmem>>, vector<1x1xf32>
    %30 = arith.mulf %28, %24 : vector<8x1xf32>
    %31 = vector.shape_cast %30 : vector<8x1xf32> to vector<1x8x1xf32>
    %cst_17 = arith.constant dense<0.000000e+00> : vector<1xf32>
    %32 = vector.multi_reduction <add>, %31, %cst_17 [1, 2] : vector<1x8x1xf32> to vector<1xf32>
    %33 = vector.shape_cast %32 : vector<1xf32> to vector<1x1x1xf32>
    %34 = vector.extract %33[0, 0, 0] : f32 from vector<1x1x1xf32>
    %35 = vector.broadcast %34 : f32 to vector<1x1xf32>
    %36 = arith.addf %29, %35 : vector<1x1xf32>
    %c0_18 = arith.constant 0 : index
    %c0_19 = arith.constant 0 : index
    %37 = vector.load %arg11[%c0_18, %c0_19] : memref<1x1xf32, #tpu.memory_space<vmem>>, vector<1x1xf32>
    tpu.vector_store %arg11[%c0_18, %c0_19], %36 {strides = array<i32>} : memref<1x1xf32, #tpu.memory_space<vmem>>, vector<1x1xf32>,
    %c0_20 = arith.constant 0 : index
    %c0_21 = arith.constant 0 : index
    %38 = vector.load %arg12[%c0_20, %c0_21] : memref<1x1xf32, #tpu.memory_space<vmem>>, vector<1x1xf32>
    %39 = vector.shape_cast %24 : vector<8x1xf32> to vector<1x8x1xf32>
    %cst_22 = arith.constant dense<0.000000e+00> : vector<1xf32>
    %40 = vector.multi_reduction <add>, %39, %cst_22 [1, 2] : vector<1x8x1xf32> to vector<1xf32>
    %41 = vector.shape_cast %40 : vector<1xf32> to vector<1x1x1xf32>
    %42 = vector.extract %41[0, 0, 0] : f32 from vector<1x1x1xf32>
    %43 = vector.broadcast %42 : f32 to vector<1x1xf32>
    %44 = arith.addf %38, %43 : vector<1x1xf32>
    %c0_23 = arith.constant 0 : index
    %c0_24 = arith.constant 0 : index
    %45 = vector.load %arg12[%c0_23, %c0_24] : memref<1x1xf32, #tpu.memory_space<vmem>>, vector<1x1xf32>
    tpu.vector_store %arg12[%c0_23, %c0_24], %44 {strides = array<i32>} : memref<1x1xf32, #tpu.memory_space<vmem>>, vector<1x1xf32>,
    %c0_i32_25 = arith.constant 0 : i32
    %46 = arith.cmpi eq, %arg0, %c0_i32_25 : i32
    %47 = arith.extui %46 : i1 to i32
    %c0_i32_26 = arith.constant 0 : i32
    %48 = arith.cmpi ne, %47, %c0_i32_26 : i32
    scf.if %48 {
      %c0_27 = arith.constant 0 : index
      %c0_28 = arith.constant 0 : index
      %49 = vector.load %arg11[%c0_27, %c0_28] : memref<1x1xf32, #tpu.memory_space<vmem>>, vector<1x1xf32>
      %c0_29 = arith.constant 0 : index
      %c0_30 = arith.constant 0 : index
      %50 = vector.load %arg12[%c0_29, %c0_30] : memref<1x1xf32, #tpu.memory_space<vmem>>, vector<1x1xf32>
      %cst_31 = arith.constant 1.000000e-10 : f32
      %51 = vector.broadcast %cst_31 : f32 to vector<1x1xf32>
      %52 = arith.addf %50, %51 : vector<1x1xf32>
      %53 = arith.divf %49, %52 : vector<1x1xf32>
      %c0_32 = arith.constant 0 : index
      %c0_33 = arith.constant 0 : index
      %54 = vector.load %arg9[%c0_32, %c0_33] : memref<1x1xf32, #tpu.memory_space<vmem>>, vector<1x1xf32>
      tpu.vector_store %arg9[%c0_32, %c0_33], %53 {strides = array<i32>} : memref<1x1xf32, #tpu.memory_space<vmem>>, vector<1x1xf32>,
      %c0_34 = arith.constant 0 : index
      %c0_35 = arith.constant 0 : index
      %55 = vector.load %arg5[%c0_34, %c0_35] : memref<1x16xf32, #tpu.memory_space<vmem>>, vector<1x16xf32>
      %c0_36 = arith.constant 0 : index
      %c0_37 = arith.constant 0 : index
      %56 = vector.load %arg3[%c0_36, %c0_37] : memref<16x5xf32, #tpu.memory_space<vmem>>, vector<16x5xf32>
      %cst_38 = arith.constant dense<0.000000e+00> : vector<1x5xf32>
      %57 = tpu.matmul %55, %56, %cst_38 {dimension_numbers = #tpu.dot_dimension_numbers<[1], [0], [0], [1], [0, 0, 1, 1], [], []>} : vector<1x16xf32>, vector<16x5xf32>, vector<1x5xf32> -> vector<1x5xf32>
      %c0_39 = arith.constant 0 : index
      %c0_40 = arith.constant 0 : index
      %58 = vector.load %arg4[%c0_39, %c0_40] : memref<1x5xf32, #tpu.memory_space<vmem>>, vector<1x5xf32>
      %59 = arith.addf %57, %58 : vector<1x5xf32>
      %60 = vector.extract_strided_slice %59 {offsets = [0, 4], sizes = [1, 1], strides = [1, 1]} : vector<1x5xf32> to vector<1x1xf32>
      %61 = arith.negf %60 : vector<1x1xf32>
      %62 = math.exp %61 : vector<1x1xf32>
      %cst_41 = arith.constant 1.000000e+00 : f32
      %63 = vector.broadcast %cst_41 : f32 to vector<1x1xf32>
      %64 = arith.addf %63, %62 : vector<1x1xf32>
      %65 = arith.divf %63, %64 : vector<1x1xf32>
      %cst_42 = arith.constant 5.000000e-01 : f32
      %66 = vector.broadcast %cst_42 : f32 to vector<1x1xf32>
      %67 = arith.subf %65, %66 : vector<1x1xf32>
      %cst_43 = arith.constant -5.000000e-02 : f32
      %68 = vector.broadcast %cst_43 : f32 to vector<1x1xf32>
      %69 = arith.maximumf %67, %68 : vector<1x1xf32>
      %c0_44 = arith.constant 0 : index
      %c0_45 = arith.constant 0 : index
      %70 = vector.load %arg10[%c0_44, %c0_45] : memref<1x1xf32, #tpu.memory_space<vmem>>, vector<1x1xf32>
      tpu.vector_store %arg10[%c0_44, %c0_45], %69 {strides = array<i32>} : memref<1x1xf32, #tpu.memory_space<vmem>>, vector<1x1xf32>,
      %c0_46 = arith.constant 0 : index
      %c0_47 = arith.constant 0 : index
      %71 = vector.load %arg6[%c0_46, %c0_47] : memref<1x128xf32, #tpu.memory_space<vmem>>, vector<1x128xf32>
      %c0_48 = arith.constant 0 : index
      %c0_49 = arith.constant 0 : index
      %72 = vector.load %arg7[%c0_48, %c0_49] : memref<1x128xf32, #tpu.memory_space<vmem>>, vector<1x128xf32>
      %73 = math.log %71 : vector<1x128xf32>
      %cst_50 = arith.constant -1.000000e+02 : f32
      %74 = vector.broadcast %cst_50 : f32 to vector<1x128xf32>
      %75 = arith.maximumf %73, %74 : vector<1x128xf32>
      %76 = arith.mulf %72, %75 : vector<1x128xf32>
      %cst_51 = arith.constant 1.000000e+00 : f32
      %77 = vector.broadcast %cst_51 : f32 to vector<1x128xf32>
      %78 = arith.subf %77, %72 : vector<1x128xf32>
      %cst_52 = arith.constant 1.000000e+00 : f32
      %79 = vector.broadcast %cst_52 : f32 to vector<1x128xf32>
      %80 = arith.subf %79, %71 : vector<1x128xf32>
      %81 = math.log %80 : vector<1x128xf32>
      %cst_53 = arith.constant -1.000000e+02 : f32
      %82 = vector.broadcast %cst_53 : f32 to vector<1x128xf32>
      %83 = arith.maximumf %81, %82 : vector<1x128xf32>
      %84 = arith.mulf %78, %83 : vector<1x128xf32>
      %85 = arith.addf %76, %84 : vector<1x128xf32>
      %cst_54 = arith.constant 0.000000e+00 : f32
      %86 = vector.broadcast %cst_54 : f32 to vector<1x128xf32>
      %87 = arith.subf %86, %85 : vector<1x128xf32>
      %88 = vector.shape_cast %87 : vector<1x128xf32> to vector<1x1x128xf32>
      %cst_55 = arith.constant dense<0.000000e+00> : vector<1xf32>
      %89 = vector.multi_reduction <add>, %88, %cst_55 [1, 2] : vector<1x1x128xf32> to vector<1xf32>
      %90 = vector.shape_cast %89 : vector<1xf32> to vector<1x1x1xf32>
      %91 = vector.extract %90[0, 0, 0] : f32 from vector<1x1x1xf32>
      %92 = vector.broadcast %91 : f32 to vector<1x1xf32>
      %cst_56 = arith.constant 1.250000e-01 : f32
      %93 = vector.broadcast %cst_56 : f32 to vector<1x1xf32>
      %94 = arith.mulf %92, %93 : vector<1x1xf32>
      %c0_57 = arith.constant 0 : index
      %c0_58 = arith.constant 0 : index
      %95 = vector.load %arg8[%c0_57, %c0_58] : memref<1x1xf32, #tpu.memory_space<vmem>>, vector<1x1xf32>
      tpu.vector_store %arg8[%c0_57, %c0_58], %94 {strides = array<i32>} : memref<1x1xf32, #tpu.memory_space<vmem>>, vector<1x1xf32>,
    } else {
    }
    return
  }
  func.func @transform_0(%arg0: i32) -> (i32, i32) {
    %c0_i32 = arith.constant 0 : i32
    %c0_i32_0 = arith.constant 0 : i32
    return %arg0, %c0_i32 : i32, i32
  }
  func.func @transform_1(%arg0: i32) -> (i32, i32) {
    %c0_i32 = arith.constant 0 : i32
    %c0_i32_0 = arith.constant 0 : i32
    return %arg0, %c0_i32 : i32, i32
  }
  func.func @transform_2(%arg0: i32) -> (i32, i32) {
    %c0_i32 = arith.constant 0 : i32
    %c0_i32_0 = arith.constant 0 : i32
    %c0_i32_1 = arith.constant 0 : i32
    return %c0_i32, %c0_i32_0 : i32, i32
  }
  func.func @transform_3(%arg0: i32) -> (i32, i32) {
    %c0_i32 = arith.constant 0 : i32
    %c0_i32_0 = arith.constant 0 : i32
    %c0_i32_1 = arith.constant 0 : i32
    return %c0_i32, %c0_i32_0 : i32, i32
  }
  func.func @transform_4(%arg0: i32) -> (i32, i32) {
    %c0_i32 = arith.constant 0 : i32
    %c0_i32_0 = arith.constant 0 : i32
    %c0_i32_1 = arith.constant 0 : i32
    return %c0_i32, %c0_i32_0 : i32, i32
  }
  func.func @transform_5(%arg0: i32) -> (i32, i32) {
    %c0_i32 = arith.constant 0 : i32
    %c0_i32_0 = arith.constant 0 : i32
    %c0_i32_1 = arith.constant 0 : i32
    return %c0_i32, %c0_i32_0 : i32, i32
  }
  func.func @transform_6(%arg0: i32) -> (i32, i32) {
    %c0_i32 = arith.constant 0 : i32
    %c0_i32_0 = arith.constant 0 : i32
    %c0_i32_1 = arith.constant 0 : i32
    return %c0_i32, %c0_i32_0 : i32, i32
  }
  func.func @transform_7(%arg0: i32) -> (i32, i32) {
    %c0_i32 = arith.constant 0 : i32
    %c0_i32_0 = arith.constant 0 : i32
    %c0_i32_1 = arith.constant 0 : i32
    return %c0_i32, %c0_i32_0 : i32, i32
  }
  func.func @transform_8(%arg0: i32) -> (i32, i32) {
    %c0_i32 = arith.constant 0 : i32
    %c0_i32_0 = arith.constant 0 : i32
    %c0_i32_1 = arith.constant 0 : i32
    return %c0_i32, %c0_i32_0 : i32, i32
  }
  func.func @transform_9(%arg0: i32) -> (i32, i32) {
    %c0_i32 = arith.constant 0 : i32
    %c0_i32_0 = arith.constant 0 : i32
    %c0_i32_1 = arith.constant 0 : i32
    return %c0_i32, %c0_i32_0 : i32, i32
  }
}

</mosaic_0001>

<bundles_post_ra>
// kernel: tpu_custom_call.1
= control target key start
LH: loop header
LB: loop body
LE: loop exit
PB: predicated region body
PF: predicated region fallthrough
CT: control target
= control target key end

     0   :  { %15 = vsyncpa [#allocation5], 0  ;;  %v480_v2 = vmov 0.0|0.0   ;;  %vm481_vm0 = vmmov 0   ;;  %v482_v4 = vmov 0.0   ;;  %s624_s0 = inlined_call_operand.vmem [shape: f32[8,16], index: 0, kind: input, shape index: {}]   ;;  %s625_s1 = inlined_call_operand.vmem [shape: f32[8,1], index: 1, kind: input, shape index: {}]   ;;  %s626_s2 = inlined_call_operand.vmem [shape: f32[16,5], index: 2, kind: input, shape index: {}]   ;;  %s627_s3 = inlined_call_operand.vmem [shape: f32[1,5], index: 3, kind: input, shape index: {}]   ;;  %s628_s4 = inlined_call_operand.vmem [shape: f32[1,16], index: 4, kind: input, shape index: {}]   ;;  %s629_s5 = inlined_call_operand.vmem [shape: f32[1,128], index: 5, kind: input, shape index: {}]   ;;  %s630_s6 = inlined_call_operand.vmem [shape: f32[1,128], index: 6, kind: input, shape index: {}]   ;;  %s631_s7 = inlined_call_operand.hbm [shape: f32[1,1], index: 7, kind: output, shape index: {0}]   ;;  %s632_s8 = inlined_call_operand.hbm [shape: f32[1,1], index: 8, kind: output, shape index: {1}]   ;;  %s633_s9 = inlined_call_operand.hbm [shape: f32[1,1], index: 9, kind: output, shape index: {2}]  }
   0x1   :  { %v39_v0 = vld [vmem:[%s626_s2] sm:$0xff]  ;;  %v40_v1 = vld [vmem:[%s626_s2 + $0x8] sm:$0xff]  ;;  %376 = vmatprep.subr.bf16.mxu0 %v480_v2  ;;  %366 = vmatprep.mubr.msk.f32.mxu0 %vm481_vm0, %v482_v4 }
   0x2   :  { %v377_v3 = vpack.c.bf16 %v40_v1, %v39_v0 }
   0x3   :  { %16 = vsyncpa [#allocation7], 0  ;;  %379 = vmatprep.subr.bf16.mxu1 %v480_v2  ;;  %373 = vmatprep.mubr.msk.f32.mxu1 %vm481_vm0, %v482_v4  ;;  %v38_v5 = vld [vmem:[%s624_s0] sm:$0xff]  ;;  %vm48_vm1 = vcmask 130048   ;;  %vm128_vm2 = vcmask 31744   ;;  %s484_s19 = smov 124  }
   0x4   :  { %378 = vmatpush3.bf16.msra.mxu0 %v377_v3  ;;  %381 = vmatpush3.bf16.msra.mxu1 %v377_v3  ;;  %v190_v6 = vld [vmem:[%s628_s4] sm:$0x1]  ;;  %s483_s4 = smov 4   ;;  %vm148_vm4 = vcmask 7168   ;;  %vm294_vm5 = vcmask 1040384   ;;  %vm35_vm6 = vcmask 0  }
   0x5   :  { %v349_v7 = vld [vmem:[%s627_s3] ss:$0 sm:$0xff]  ;;  %36 = vst.msk [vmem:[#allocation2] sm:$0x1] %vm35_vm6, %v482_v4  ;;  %37 = vst.msk [vmem:[#allocation3] sm:$0x1] %vm35_vm6, %v482_v4 }
   0x6   :  { %v134_v16 = vld [vmem:[%s625_s1] sm:$0xff] }
   0x7   :  { %367 = vmatmul.mubr.msk.f32.vlgmr.msra.gmra.mrb[0].mxu0 %vm48_vm1, %v38_v5  ;;  %374 = vmatmul.mubr.msk.f32.vlgmr.msra.gmra.mrb[0].mxu1 %vm48_vm1, %v190_v6  ;;  %v280_v26 = vld [vmem:[%s629_s5] sm:$0x1] }
   0x8   :  { %v287_v27 = vsub.f32 1.0, %v280_v26  ;;  %v193_v28 = vld [vmem:[%s627_s3] sm:$0x1] }
   0x9   :  { %v281_v35 = vld [vmem:[%s630_s6] sm:$0x1]  ;;  %s485_s6 = smov [#allocation4]  }
   0xa   :  { %v286_v37 = vsub.f32 1.0, %v281_v35  ;;  %s314_s25 = sshll.u32 %s485_s6, 4  ;;  %s315_s25 = int_to_ptr.vmem [resolvable:$true] %s314_s25 }
   0xb   :  { %s410_s27 = scalar_lea.vmem %s315_s25, 16  ;;  %s414_s28 = scalar_lea.vmem %s315_s25, 32 }
   0xc   :  { %p411_p0 = scmp.ne.s32.totalorder %s315_s25, %s410_s27  ;;  %p415_p1 = scmp.lt.s32.totalorder %s315_s25, %s315_s25 }
   0xd   :  { %p416_p2 = scmp.lt.s32.totalorder %s414_s28, %s410_s27 }
   0xf   :  { %p417_p3 = por %p416_p2, %p415_p1 }
  0x11   :  { %p418_p4 = pnand %p417_p3, %p411_p0 }
  0xda   :  { %v118_v8 = vpop.f32.mrb[0].mxu0  ;;  %v263_v19 = vpop.f32.mrb[0].mxu1 }
  0xdb   :  { %v119_v9 = vadd.f32 %v349_v7, %v118_v8  ;;  %v368_v10 = vpop.f32.mrb[1].mxu0  ;;  %v375_v20 = vpop.f32.mrb[1].mxu1  ;;  %v264_v29 = vadd.f32 %v263_v19, %v193_v28 }
  0xdd   :  { %v351_v11 = vmul.f32 -1.442695, %v119_v9  ;;  %v354_v32 = vmul.f32 -1.442695, %v264_v29 }
  0xdf   :  { %396 = vpow2.f32 %v351_v11  ;;  %v142_v11 = vld [vmem:[#allocation2] sm:$0x1] }
  0xe9   :  { %v397_v12 = vpop.eup %396 }
  0xea   :  { %v125_v13 = vadd.f32 1.0, %v397_v12 }
  0xec   :  { %398 = vrcp.f32 %v125_v13 }
  0xed   :  { %400 = vlog2.f32 %v280_v26 }
  0xee   :  { %402 = vlog2.f32 %v287_v27 }
  0xef   :  { %404 = vpow2.f32 %v354_v32 }
  0xf6   :  { %v399_v14 = vpop.eup %398 }
  0xf7   :  { %v129_v15 = vsel %vm128_vm2, %v399_v14, inf  ;;  %vm132_vm3 = vcmp.gt.f32.partialorder %v399_v14, 0.5  ;;  %v401_v30 = vpop.eup %400  ;;  %v163_v14 = vld [vmem:[#allocation3] sm:$0x1] }
  0xf8   :  { %130 = vmin.xlane.f32.xlu0 %v129_v15  ;;  %v133_v21 = vsel %vm132_vm3, 1.0, %v482_v4  ;;  %v403_v31 = vpop.eup %402  ;;  %v283_v33 = vmul.f32 0.6931472, %v401_v30 }
  0xf9   :  { %v289_v34 = vmul.f32 0.6931472, %v403_v31  ;;  %v405_v41 = vpop.eup %404 }
  0xfa   :  { %v284_v36 = vmax.f32 %v283_v33, -100.0  ;;  %v270_v43 = vadd.f32 1.0, %v405_v41 }
  0xfb   :  { %v290_v38 = vmax.f32 %v289_v34, -100.0 }
  0xfc   :  { %v285_v39 = vmul.f32 %v284_v36, %v281_v35  ;;  %406 = vrcp.f32 %v270_v43 }
  0xfd   :  { %v291_v40 = vmul.f32 %v290_v38, %v286_v37 }
  0xff   :  { %v292_v42 = vadd.f32 %v291_v40, %v285_v39 }
 0x101   :  { %v293_v44 = vsub.f32 0.0, %v292_v42 }
 0x103   :  { %v295_v47 = vsel %vm294_vm5, %v293_v44, 0.0 }
 0x106   :  { %v407_v50 = vpop.eup %406 }
 0x107   :  { %v355_v51 = vadd.f32 -0.5, %v407_v50 }
 0x109   :  { %v274_v52 = vmax.f32 %v355_v51, -0.05 }
 0x10e   :  { %136 = vrot.lane.b32.xlu0 %v134_v16, %s483_s4 }
 0x185   :  { %v131_v17 = vpop.xlane.xlu0 %130 }
 0x186   :  { %v352_v18 = vadd.f32 -0.5, %v131_v17 }
 0x188   :  { %v141_v23 = vmax.f32 %v352_v18, -0.05 }
 0x189   :  { %v137_v22 = vpop.permute.xlu0 %136 }
 0x18a   :  { %v139_v24 = vmul.f32 %v137_v22, %v133_v21 }
 0x18c   :  { %v143_v25 = vmul.f32 %v141_v23, %v139_v24 }
 0x18e   :  { %145 = vrot.lane.b32.xlu1 %v143_v25, %s484_s19 }
 0x192   :  { %165 = vrot.lane.b32.xlu1 %v139_v24, %s484_s19 }
 0x200   :  { %v146_v45 = vpop.permute.xlu1 %145 }
 0x201   :  { %v149_v46 = vsel %vm148_vm4, %v146_v45, 0.0 }
 0x202   :  { %150 = vadd.xlane.f32.xlu1 %v149_v46 }
 0x204   :  { %v166_v48 = vpop.permute.xlu1 %165 }
 0x205   :  { %v168_v49 = vsel %vm148_vm4, %v166_v48, 0.0 }
 0x206   :  { %169 = vadd.xlane.f32.xlu0 %v168_v49  ;;  %296 = vadd.xlane.f32.xlu1 %v295_v47 }
 0x217   :  { %276 = vrot.lane.b32.xlu1 %v274_v52, %s484_s19 }
 0x28f   :  { %v151_v53 = vpop.xlane.xlu1 %150 }
 0x290   :  { %v152_v54 = vrot.slane %v151_v53, 4 }
 0x292   :  { %v153_v55 = vadd.f32 %v152_v54, %v151_v53 }
 0x293   :  { %v170_v56 = vpop.xlane.xlu0 %169  ;;  %v297_v57 = vpop.xlane.xlu1 %296 }
 0x294   :  { %v154_v58 = vrot.slane %v153_v55, 2  ;;  %v171_v59 = vrot.slane %v170_v56, 4  ;;  %v298_v60 = vrot.slane %v297_v57, 4 }
 0x296   :  { %v172_v61 = vadd.f32 %v171_v59, %v170_v56  ;;  %v155_v62 = vadd.f32 %v154_v58, %v153_v55  ;;  %v299_v63 = vadd.f32 %v298_v60, %v297_v57 }
 0x297   :  { %v277_v0 = vpop.permute.xlu1 %276 }
 0x298   :  { %v173_v1 = vrot.slane %v172_v61, 2  ;;  %v156_v2 = vrot.slane %v155_v62, 1  ;;  %v300_v3 = vrot.slane %v299_v63, 2  ;;  %279 = vst.msk [vmem:[#allocation8] sm:$0x1] %vm35_vm6, %v277_v0 }
 0x29a   :  { %v174_v5 = vadd.f32 %v173_v1, %v172_v61  ;;  %v157_v6 = vadd.f32 %v156_v2, %v155_v62  ;;  %v301_v4 = vadd.f32 %v300_v3, %v299_v63 }
 0x29c   :  { %382 = vpush %v157_v6  ;;  %v175_v7 = vrot.slane %v174_v5, 1  ;;  %v302_v8 = vrot.slane %v301_v4, 1 }
 0x29e   :  { %v176_v9 = vadd.f32 %v175_v7, %v174_v5  ;;  %v303_v10 = vadd.f32 %v302_v8, %v301_v4 }
 0x2a0   :  { %384 = vpush %v176_v9 }
 0x2a1   :  { %386 = vpush %v303_v10 }
 0x2cd   :  { %s383_s3 = spop %382 }
 0x2ce   :  { %v159_v12 = vstv %s383_s3 }
 0x2cf   :  { %v160_v13 = vadd.f32 %v159_v12, %v142_v11 }
 0x2d1   :  { %162 = vst.msk [vmem:[#allocation2] sm:$0x1] %vm35_vm6, %v160_v13  ;;  %s385_s5 = spop %384 }
 0x2d2   :  { %v178_v15 = vstv %s385_s5  ;;  %s387_s26 = spop %386 }
 0x2d3   :  { %v179_v16 = vadd.f32 %v178_v15, %v163_v14  ;;  %v305_v17 = vstv %s387_s26 }
 0x2d4   :  { %v306_v18 = vmul.f32 0.125, %v305_v17 }
 0x2d5   :  { %180 = vst.msk [vmem:[#allocation3] sm:$0x1] %vm35_vm6, %v179_v16 }
 0x2d6   :  { %307 = vst.msk [vmem:[#allocation4] sm:$0x1] %vm35_vm6, %v306_v18 }
 0x2d7   :  { %421 = shalt.err (!%p418_p4)
}
 0x2d8   :  { %s422_s10 = scalar_lea.hbm %s631_s7, 16 }
 0x2d9   :  { %p423_p5 = scmp.ne.s32.totalorder %s631_s7, %s422_s10  ;;  %p426_p6 = scmp.lt.u32.totalorder %s422_s10, %s631_s7 }
 0x2db   :  { %p428_p7 = pnand %p426_p6, %p423_p5 }
 0x2dd   :  { %431 = shalt.err (!%p428_p7)
}
 0x2de   :  { %317 = dma.vmem_to_hbm [thread:$0]  %s315_s25, 16, %s631_s7, [#allocation5]   ;;  %v185_v19 = vld [vmem:[#allocation3] sm:$0x1]  ;;  %v184_v22 = vld [vmem:[#allocation2] sm:$0x1] }
 0x2df   :  { %v186_v20 = vadd.f32 1e-10, %v185_v19  ;;  %s486_s16 = smov [#allocation6]   ;;  %s487_s0 = smov [#allocation8]  }
 0x2e0   :  { %s324_s17 = sshll.u32 %s486_s16, 4  ;;  %s334_s18 = sshll.u32 %s487_s0, 4  ;;  %s325_s17 = int_to_ptr.vmem [resolvable:$true] %s324_s17  ;;  %s591_s18 = int_to_ptr.vmem [resolvable:$true] %s334_s18 }
 0x2e1   :  { %408 = vrcp.f32 %v186_v20  ;;  %s432_s4 = scalar_lea.vmem %s325_s17, 16  ;;  %s436_s19 = scalar_lea.vmem %s325_s17, 32 }
 0x2e2   :  { %p433_p8 = scmp.ne.s32.totalorder %s325_s17, %s432_s4  ;;  %p437_p9 = scmp.lt.s32.totalorder %s325_s17, %s325_s17 }
 0x2e3   :  { %p438_p10 = scmp.lt.s32.totalorder %s436_s19, %s432_s4 }
 0x2e5   :  { %p439_p11 = por %p438_p10, %p437_p9 }
 0x2e7   :  { %p440_p12 = pnand %p439_p11, %p433_p8 }
 0x2eb   :  { %v409_v21 = vpop.eup %408 }
 0x2ec   :  { %v188_v23 = vmul.f32 %v409_v21, %v184_v22 }
 0x2ee   :  { %189 = vst.msk [vmem:[#allocation6] sm:$0x1] %vm35_vm6, %v188_v23 }
 0x2ef   :  { %443 = shalt.err (!%p440_p12)
}
 0x2f0   :  { %s444_s1 = scalar_lea.hbm %s632_s8, 16 }
 0x2f1   :  { %p445_p13 = scmp.ne.s32.totalorder %s632_s8, %s444_s1  ;;  %p448_p0 = scmp.lt.u32.totalorder %s444_s1, %s632_s8 }
 0x2f3   :  { %p450_p1 = pnand %p448_p0, %p445_p13 }
 0x2f5   :  { %453 = shalt.err (!%p450_p1)
}
 0x2f6   :  { %327 = dma.vmem_to_hbm [thread:$0]  %s325_s17, 16, %s632_s8, [#allocation7]  }
 0x2f7   :  { %s454_s6 = scalar_lea.vmem %s591_s18, 16  ;;  %s458_s25 = scalar_lea.vmem %s591_s18, 32 }
 0x2f8   :  { %p455_p2 = scmp.ne.s32.totalorder %s591_s18, %s454_s6  ;;  %p459_p3 = scmp.lt.s32.totalorder %s591_s18, %s591_s18 }
 0x2f9   :  { %p460_p4 = scmp.lt.s32.totalorder %s458_s25, %s454_s6 }
 0x2fb   :  { %p461_p5 = por %p460_p4, %p459_p3 }
 0x2fd   :  { %p462_p6 = pnand %p461_p5, %p455_p2 }
 0x2ff   :  { %465 = shalt.err (!%p462_p6)
}
 0x300   :  { %s466_s28 = scalar_lea.hbm %s633_s9, 16 }
 0x301   :  { %p467_p7 = scmp.ne.s32.totalorder %s633_s9, %s466_s28  ;;  %p470_p8 = scmp.lt.u32.totalorder %s466_s28, %s633_s9 }
 0x303   :  { %p472_p9 = pnand %p470_p8, %p467_p7 }
 0x305   :  { %475 = shalt.err (!%p472_p9)
}
 0x306   :  { %337 = dma.vmem_to_hbm [thread:$0]  %s591_s18, 16, %s633_s9, [#allocation7]  }
 0x307   :  { %476 = dma.done.wait [#allocation5], 16  }
 0x308   :  { %477 = vsyncadd [#allocation5], 4294967280 }
 0x309   :  { %478 = dma.done.wait [#allocation7], 32  }
 0x30a   :  { %479 = vsyncadd [#allocation7], 4294967264 }
 0x30b   :  { %347 = vsyncpa [#allocation5], 1 }
 0x30c   :  { %348 = vsyncpa [#allocation7], 1 }

</bundles_post_ra>
